<compile_context>
chip_gen: v5e
topology: v5e:2x2
jax: 0.10.0
libtpu: 0.0.40
codegen_flags: <defaults>
</compile_context>

<pallas_src>
import jax
import jax.numpy as jnp
from jax import lax
from jax.experimental import pallas as pl
from jax.experimental.pallas import tpu as pltpu


def _round_up(x, m):
    return ((x + m - 1) // m) * m


def _cdiv(a, b):
    return -(-a // b)


# ---------------------------------------------------------------------------
# Pallas kernel: tiled GEMM + bias (conv as im2col matmul).
#   p_ref: (tm, tk) patches tile      w_ref: (tk, tn) masked-weight tile
#   b_ref: (1, tn)  bias tile         o_ref: (tm, tn) f32 output tile
# o_ref's index_map does not depend on k, so it stays VMEM-resident across the
# reduction axis and serves as the accumulator (no scratch, no extra copy).
# ---------------------------------------------------------------------------
def _matmul_bias_kernel(p_ref, w_ref, b_ref, o_ref):
    k = pl.program_id(2)

    @pl.when(k == 0)
    def _():
        o_ref[...] = jnp.zeros_like(o_ref)

    o_ref[...] += jnp.dot(p_ref[...], w_ref[...],
                          preferred_element_type=jnp.float32)

    @pl.when(k == pl.num_programs(2) - 1)
    def _():
        o_ref[...] += b_ref[...]


def _im2col_nhwc(x, k):
    """x: (N, C, H, W) -> patches (N*Ho*Wo, K*K*C) in (kh, kw, c) order."""
    n, c, h, w = x.shape
    ho, wo = h - k + 1, w - k + 1
    x_nhwc = jnp.transpose(x, (0, 2, 3, 1))                       # (N, H, W, C)
    cols = [x_nhwc[:, kh:kh + ho, kw:kw + wo, :]
            for kh in range(k) for kw in range(k)]                # (N,Ho,Wo,C)
    patches = jnp.stack(cols, axis=3)                             # (N,Ho,Wo,K*K,C)
    return patches.reshape(n * ho * wo, k * k * c), ho, wo


def conv2d_layer_w(x, weight, weight_aux, bias, *,
                   tm=1024, tn=512, tk=1024, compute_dtype=None):
    """Forward of Conv2DLayerW (stride=1, padding=0, dilation=1, groups=1).

    compute_dtype: dtype of the MXU inputs (patches / masked weight). Default
    is x.dtype (f32 -> exact PyTorch semantics). Set jnp.bfloat16 on v6e/v7x
    for ~2-4x MXU rate and half the streamed HBM bytes (f32 accumulation kept).
    """
    n, cin, h, w = x.shape
    cout, _, k, _ = weight.shape
    if compute_dtype is None:
        compute_dtype = x.dtype

    # STE forward mask (aux > 0); plain jnp so XLA fuses it into the weight
    # transpose/pad below (cheaper than a dedicated whole-array pallas_call).
    w_sparse = weight * (weight_aux > 0).astype(weight.dtype)

    # TODO(synk): eliminate the im2col HBM materialization by folding the
    # (kh, kw) shifts into the reduction axis (manual DMAs at element offsets
    # kh*W + kw over NHWC activations, weight kept VMEM-resident); kept as
    # plain-JAX glue here for robustness.
    patches, ho, wo = _im2col_nhwc(x, k)                          # (M, Kdim)
    m, kdim = patches.shape

    # Weight OIHW -> (kh, kw, I, O) flattened to (Kdim, Cout): matches the
    # patch (kh, kw, c) ordering, no in-kernel transpose, Cout on the lane dim.
    w2d = jnp.transpose(w_sparse, (2, 3, 1, 0)).reshape(kdim, cout)
    b2d = bias.reshape(1, cout).astype(jnp.float32)

    # ---- tile selection -----------------------------------------------------
    # M: sublane-aligned; ensure >= 2 blocks so both v7x TensorCores get work.
    m_pad = _round_up(m, 8)
    tm = min(tm, m_pad)
    if m_pad // tm < 2 and m_pad > 8:
        tm = _round_up(_cdiv(m_pad, 2), 8)
    m_pad = _round_up(m_pad, tm)

    # Kdim: no 128-padding. One full-Kdim block when it fits; otherwise
    # 128-aligned chunks sized to minimize padding.
    if kdim <= tk:
        tk = kdim
        k_pad = kdim
    else:
        nk = _cdiv(kdim, tk)
        tk = _round_up(_cdiv(kdim, nk), 128)
        k_pad = tk * nk

    # Cout: one full-Cout block when it fits (weight tile VMEM-resident, the
    # patches operand streams from HBM exactly once); else 128-aligned chunks.
    if cout <= tn:
        tn = cout
        n_pad = cout
    else:
        tn = max(128, (min(tn, 512) // 128) * 128)
        n_pad = _round_up(cout, tn)

    patches_p = jnp.pad(patches, ((0, m_pad - m), (0, k_pad - kdim)))
    w_p = jnp.pad(w2d, ((0, k_pad - kdim), (0, n_pad - cout)))
    b_p = jnp.pad(b2d, ((0, 0), (0, n_pad - cout)))

    # Cast MXU inputs in the wrapper so HBM bytes also shrink for bf16.
    patches_p = patches_p.astype(compute_dtype)
    w_p = w_p.astype(compute_dtype)

    grid = (m_pad // tm, n_pad // tn, k_pad // tk)

    out = pl.pallas_call(
        _matmul_bias_kernel,
        out_shape=jax.ShapeDtypeStruct((m_pad, n_pad), jnp.float32),
        grid_spec=pltpu.PrefetchScalarGridSpec(
            num_scalar_prefetch=0,
            grid=grid,
            in_specs=[
                pl.BlockSpec((tm, tk), lambda i, j, kk: (i, kk)),   # patches
                pl.BlockSpec((tk, tn), lambda i, j, kk: (kk, j)),   # masked W
                pl.BlockSpec((1, tn), lambda i, j, kk: (0, j)),     # bias
            ],
            out_specs=pl.BlockSpec((tm, tn), lambda i, j, kk: (i, j)),
        ),
        compiler_params=pltpu.CompilerParams(
            dimension_semantics=("parallel", "parallel", "arbitrary"),
            vmem_limit_bytes=48 * 1024 * 1024,
        ),
    )(patches_p, w_p, b_p)

    out = out[:m, :cout].astype(x.dtype)                          # drop padding
    # TODO(synk): return NHWC directly when the consumer allows, to skip this
    # full-tensor transpose back to the module's NCHW layout.
    return out.reshape(n, ho, wo, cout).transpose(0, 3, 1, 2)


if __name__ == "__main__":
    # Small shapes consistent with the module: N=2, Cin=4, Cout=8, H=W=16, K=3
    N, CIN, COUT, H, W, K = 2, 4, 8, 16, 16, 3
    key = jax.random.PRNGKey(0)
    kx, kw, ka, kb = jax.random.split(key, 4)

    x = jax.random.normal(kx, (N, CIN, H, W), dtype=jnp.float32)

    # Deterministic in-script parameter init (mimics kaiming/uniform shapes).
    fan_in = CIN * K * K
    bound_w = (6.0 / fan_in) ** 0.5
    weight = jax.random.uniform(kw, (COUT, CIN, K, K), jnp.float32,
                                -bound_w, bound_w)
    # uniform in [-1, 1) so the STE mask actually zeros some weights
    weight_aux = jax.random.uniform(ka, (COUT, CIN, K, K), jnp.float32, -1.0, 1.0)
    bound_b = 1.0 / (fan_in ** 0.5)
    bias = jax.random.uniform(kb, (COUT,), jnp.float32, -bound_b, bound_b)

    out = conv2d_layer_w(x, weight, weight_aux, bias)   # f32 path = exact semantics
    out = jax.block_until_ready(out)

    # Pure-JAX reference for sanity check.
    w_sparse = weight * (weight_aux > 0).astype(weight.dtype)
    ref = lax.conv_general_dilated(
        x, w_sparse, window_strides=(1, 1), padding="VALID",
        dimension_numbers=("NCHW", "OIHW", "NCHW"))
    ref = ref + bias[None, :, None, None]

    assert out.shape == (N, COUT, H - K + 1, W - K + 1), out.shape
    assert jnp.allclose(out, ref, rtol=1e-4, atol=1e-4), "mismatch vs reference"
    print("KERNEL_OK")
</pallas_src>

<mosaic_0001>
module attributes {stable_mosaic.version = 11 : i64} {
  func.func @_matmul_bias_kernel(%arg0: i32, %arg1: i32, %arg2: i32, %arg3: memref<200x36xf32, #tpu.memory_space<vmem>>, %arg4: memref<36x8xf32, #tpu.memory_space<vmem>>, %arg5: memref<1x8xf32, #tpu.memory_space<vmem>>, %arg6: memref<200x8xf32, #tpu.memory_space<vmem>>) attributes {dimension_semantics = [#tpu.dimension_semantics<parallel>, #tpu.dimension_semantics<parallel>, #tpu.dimension_semantics<arbitrary>], iteration_bounds = array<i64: 2, 1, 1>, scalar_prefetch = 0 : i64, scratch_operands = 0 : i64, tpu.core_type = #tpu.core_type<tc>, window_params = [{transform_indices = @transform_0, window_bounds = array<i64: 200, 36>}, {transform_indices = @transform_1, window_bounds = array<i64: 36, 8>}, {transform_indices = @transform_2, window_bounds = array<i64: 1, 8>}, {transform_indices = @transform_3, window_bounds = array<i64: 200, 8>}]} {
    %c0_i32 = arith.constant 0 : i32
    %0 = arith.cmpi eq, %arg2, %c0_i32 : i32
    %1 = arith.extui %0 : i1 to i32
    %c0_i32_0 = arith.constant 0 : i32
    %2 = arith.cmpi ne, %1, %c0_i32_0 : i32
    scf.if %2 {
      %cst_10 = arith.constant 0.000000e+00 : f32
      %12 = vector.broadcast %cst_10 : f32 to vector<200x8xf32>
      %c0_11 = arith.constant 0 : index
      %c0_12 = arith.constant 0 : index
      %13 = vector.load %arg6[%c0_11, %c0_12] : memref<200x8xf32, #tpu.memory_space<vmem>>, vector<200x8xf32>
      tpu.vector_store %arg6[%c0_11, %c0_12], %12 {strides = array<i32>} : memref<200x8xf32, #tpu.memory_space<vmem>>, vector<200x8xf32>,
    } else {
    }
    %c0 = arith.constant 0 : index
    %c0_1 = arith.constant 0 : index
    %3 = vector.load %arg6[%c0, %c0_1] : memref<200x8xf32, #tpu.memory_space<vmem>>, vector<200x8xf32>
    %c0_2 = arith.constant 0 : index
    %c0_3 = arith.constant 0 : index
    %4 = vector.load %arg3[%c0_2, %c0_3] : memref<200x36xf32, #tpu.memory_space<vmem>>, vector<200x36xf32>
    %c0_4 = arith.constant 0 : index
    %c0_5 = arith.constant 0 : index
    %5 = vector.load %arg4[%c0_4, %c0_5] : memref<36x8xf32, #tpu.memory_space<vmem>>, vector<36x8xf32>
    %cst = arith.constant dense<0.000000e+00> : vector<200x8xf32>
    %6 = tpu.matmul %4, %5, %cst {dimension_numbers = #tpu.dot_dimension_numbers<[1], [0], [0], [1], [0, 0, 1, 1], [], []>} : vector<200x36xf32>, vector<36x8xf32>, vector<200x8xf32> -> vector<200x8xf32>
    %7 = arith.addf %3, %6 : vector<200x8xf32>
    %c0_6 = arith.constant 0 : index
    %c0_7 = arith.constant 0 : index
    %8 = vector.load %arg6[%c0_6, %c0_7] : memref<200x8xf32, #tpu.memory_space<vmem>>, vector<200x8xf32>
    tpu.vector_store %arg6[%c0_6, %c0_7], %7 {strides = array<i32>} : memref<200x8xf32, #tpu.memory_space<vmem>>, vector<200x8xf32>,
    %c0_i32_8 = arith.constant 0 : i32
    %9 = arith.cmpi eq, %arg2, %c0_i32_8 : i32
    %10 = arith.extui %9 : i1 to i32
    %c0_i32_9 = arith.constant 0 : i32
    %11 = arith.cmpi ne, %10, %c0_i32_9 : i32
    scf.if %11 {
      %c0_10 = arith.constant 0 : index
      %c0_11 = arith.constant 0 : index
      %12 = vector.load %arg6[%c0_10, %c0_11] : memref<200x8xf32, #tpu.memory_space<vmem>>, vector<200x8xf32>
      %c0_12 = arith.constant 0 : index
      %c0_13 = arith.constant 0 : index
      %13 = vector.load %arg5[%c0_12, %c0_13] : memref<1x8xf32, #tpu.memory_space<vmem>>, vector<1x8xf32>
      %14 = vector.broadcast %13 : vector<1x8xf32> to vector<200x8xf32>
      %15 = arith.addf %12, %14 : vector<200x8xf32>
      %c0_14 = arith.constant 0 : index
      %c0_15 = arith.constant 0 : index
      %16 = vector.load %arg6[%c0_14, %c0_15] : memref<200x8xf32, #tpu.memory_space<vmem>>, vector<200x8xf32>
      tpu.vector_store %arg6[%c0_14, %c0_15], %15 {strides = array<i32>} : memref<200x8xf32, #tpu.memory_space<vmem>>, vector<200x8xf32>,
    } else {
    }
    return
  }
  func.func @transform_0(%arg0: i32, %arg1: i32, %arg2: i32) -> (i32, i32) {
    %c0_i32 = arith.constant 0 : i32
    return %arg0, %arg2 : i32, i32
  }
  func.func @transform_1(%arg0: i32, %arg1: i32, %arg2: i32) -> (i32, i32) {
    %c0_i32 = arith.constant 0 : i32
    return %arg2, %arg1 : i32, i32
  }
  func.func @transform_2(%arg0: i32, %arg1: i32, %arg2: i32) -> (i32, i32) {
    %c0_i32 = arith.constant 0 : i32
    %c0_i32_0 = arith.constant 0 : i32
    return %c0_i32, %arg1 : i32, i32
  }
  func.func @transform_3(%arg0: i32, %arg1: i32, %arg2: i32) -> (i32, i32) {
    %c0_i32 = arith.constant 0 : i32
    return %arg0, %arg1 : i32, i32
  }
}

</mosaic_0001>

<bundles_post_ra>
// kernel: tpu_custom_call.1
= control target key start
LH: loop header
LB: loop body
LE: loop exit
PB: predicated region body
PF: predicated region fallthrough
CT: control target
= control target key end

     0   :  { %s883_s12 = smov 0   ;;  %s885_s13 = smov 0   ;;  %s1222_s0 = inlined_call_operand.vmem [shape: f32[400,36], index: 0, kind: input, shape index: {}]   ;;  %s1223_s1 = inlined_call_operand.vmem [shape: f32[36,8], index: 1, kind: input, shape index: {}]   ;;  %s1224_s2 = inlined_call_operand.vmem [shape: f32[1,8], index: 2, kind: input, shape index: {}]   ;;  %s1225_s3 = inlined_call_operand.vmem [shape: f32[400,8], index: 3, kind: output, shape index: {}]  }
   0x1   :  { %s887_s14 = smov 0  }
   0x2 LB: > { %s32_s15 = sadd.s32 1, %s856_s13  ;;  %p766_p0 = scmp.ge.s32.totalorder %s860_s14, 1  ;;  %s860_s14 = sphi %s887_s14, %s13_s14   ;;  %s856_s13 = sphi %s885_s13, %s1227_s13   ;;  %s852_s12 = sphi %s883_s12, %s1226_s12  }
   0x3   : > { %p34_p1 = scmp.ge.s32.totalorder %s32_s15, 2  ;;  %p188_p2 = scmp.lt.s32.totalorder %s860_s14, 3 }
   0x5   : > { %s1229_s15 = smov (%p34_p1, %s32_s15), 0  ;;  %p189_p3 = pnand %p766_p0, %p188_p2 }
   0x6   : > { %s229_s20 = smul.u32 (!%p189_p3), 25, %s852_s12 }
   0x7   : > { %192 = sbr.rel (%p189_p3) target bundleno = 215 (0xd7), region = 32 }
   0x8   : > { %p230_p4 = scmp.lt.s32.totalorder (!%p189_p3), %s229_s20, 49 }
   0xc   : > { %v343_v0 = vld [vmem:[%s1223_s1 + $0x20] sm:$0xf]  ;;  %vm420_vm0 = vcmask 1043456   ;;  %v342_v1 = vld [vmem:[%s1223_s1 + $0x18] sm:$0xff]  ;;  %v341_v2 = vld [vmem:[%s1223_s1 + $0x10] sm:$0xff]  ;;  %s1231_s20 = smov (!%p230_p4, %s229_s20), 49 }
   0xd   : > { %798 = vmatpush.msk.msra.mxu2 %vm420_vm0, %v343_v0  ;;  %799 = vmatpush.msk.msra.mxu3 %vm420_vm0, %v343_v0  ;;  %v340_v3 = vld [vmem:[%s1223_s1 + $0x8] sm:$0xff]  ;;  %v339_v4 = vld [vmem:[%s1223_s1] sm:$0xff]  ;;  %s767_s27 = sshll.u32 %s1231_s20, 3  ;;  %vm344_vm1 = vcmask 293888   ;;  %vm263_vm2 = vcmask 64512   ;;  %v862_v17 = vmov 0.0  }
   0xe   : > { %769 = vmatpush.msk.msra.mxu0 %vm420_vm0, %v343_v0  ;;  %797 = vmatpush.msk.msra.mxu1 %vm420_vm0, %v343_v0  ;;  %s924_s30 = scalar_lea.vmem %s1222_s0, %s767_s27  ;;  %s949_s6 = scalar_lea.vmem %s1225_s3, %s767_s27  ;;  %v1050_v47 = vld [vmem:[%s1224_s2] ss:$0 sm:$0xff] }
   0xf   : > { %801 = vmatpush.msra.mxu2 %v342_v1  ;;  %802 = vmatpush.msra.mxu3 %v342_v1  ;;  %v326_v5 = vld [vmem:[%s924_s30 + $0x60] sm:$0xff]  ;;  %v333_v6 = vld [vmem:[%s924_s30 + $0x98] sm:$0xff]  ;;  %v320_v8 = vld [vmem:[%s924_s30 + $0x30] sm:$0xff]  ;;  %276 = vst.msk [vmem:[%s949_s6 + $0x60] sm:$0xff] %vm263_vm2, %v862_v17 }
  0x10   : > { %436 = vmatpush.msra.mxu0 %v342_v1  ;;  %800 = vmatpush.msra.mxu1 %v342_v1  ;;  %v314_v7 = vld [vmem:[%s924_s30] sm:$0xff]  ;;  %v327_v9 = vld [vmem:[%s924_s30 + $0x68] sm:$0xff]  ;;  %v321_v12 = vld [vmem:[%s924_s30 + $0x38] sm:$0xff]  ;;  %264 = vst.msk [vmem:[%s949_s6] sm:$0xff] %vm263_vm2, %v862_v17 }
  0x11   : > { %804 = vmatpush.msra.mxu2 %v341_v2  ;;  %805 = vmatpush.msra.mxu3 %v341_v2  ;;  %v334_v10 = vld [vmem:[%s924_s30 + $0xa0] sm:$0xff]  ;;  %v315_v11 = vld [vmem:[%s924_s30 + $0x8] sm:$0xff]  ;;  %v328_v13 = vld [vmem:[%s924_s30 + $0x70] sm:$0xff]  ;;  %265 = vst.msk [vmem:[%s949_s6 + $0x8] sm:$0xff] %vm263_vm2, %v862_v17 }
  0x12   : > { %437 = vmatpush.msra.mxu0 %v341_v2  ;;  %803 = vmatpush.msra.mxu1 %v341_v2  ;;  %v335_v14 = vld [vmem:[%s924_s30 + $0xa8] sm:$0xff]  ;;  %v316_v15 = vld [vmem:[%s924_s30 + $0x10] sm:$0xff]  ;;  %v322_v16 = vld [vmem:[%s924_s30 + $0x40] sm:$0xff]  ;;  %266 = vst.msk [vmem:[%s949_s6 + $0x10] sm:$0xff] %vm263_vm2, %v862_v17 }
  0x13   : > { %807 = vmatpush.msra.mxu2 %v340_v3  ;;  %808 = vmatpush.msra.mxu3 %v340_v3  ;;  %v329_v18 = vld [vmem:[%s924_s30 + $0x78] sm:$0xff]  ;;  %v336_v19 = vld [vmem:[%s924_s30 + $0xb0] sm:$0xff]  ;;  %267 = vst.msk [vmem:[%s949_s6 + $0x18] sm:$0xff] %vm263_vm2, %v862_v17  ;;  %v323_v21 = vld [vmem:[%s924_s30 + $0x48] sm:$0xff] }
  0x14   : > { %438 = vmatpush.msra.mxu0 %v340_v3  ;;  %806 = vmatpush.msra.mxu1 %v340_v3  ;;  %268 = vst.msk [vmem:[%s949_s6 + $0x20] sm:$0xff] %vm263_vm2, %v862_v17  ;;  %v317_v20 = vld [vmem:[%s924_s30 + $0x18] sm:$0xff]  ;;  %v330_v22 = vld [vmem:[%s924_s30 + $0x80] sm:$0xff]  ;;  %v324_v25 = vld [vmem:[%s924_s30 + $0x50] sm:$0xff] }
  0x15   : > { %810 = vmatpush.msra.mxu2 %v339_v4  ;;  %811 = vmatpush.msra.mxu3 %v339_v4  ;;  %269 = vst.msk [vmem:[%s949_s6 + $0x28] sm:$0xff] %vm263_vm2, %v862_v17  ;;  %v337_v23 = vld [vmem:[%s924_s30 + $0xb8] sm:$0xff]  ;;  %v318_v24 = vld [vmem:[%s924_s30 + $0x20] sm:$0xff]  ;;  %v331_v26 = vld [vmem:[%s924_s30 + $0x88] sm:$0xff] }
  0x16   : > { %782 = vmatmul.msk.f32.vlgmr.msra.gmra.mxu2 %vm344_vm1, %v326_v5  ;;  %789 = vmatmul.msk.f32.vlgmr.msra.gmra.mxu3 %vm344_vm1, %v333_v6  ;;  %270 = vst.msk [vmem:[%s949_s6 + $0x30] sm:$0xff] %vm263_vm2, %v862_v17  ;;  %v338_v27 = vld [vmem:[%s924_s30 + $0xc0] sm:$0xff]  ;;  %v319_v28 = vld [vmem:[%s924_s30 + $0x28] sm:$0xff]  ;;  %v325_v29 = vld [vmem:[%s924_s30 + $0x58] sm:$0xff] }
  0x17   : > { %439 = vmatpush.msra.mxu0 %v339_v4  ;;  %809 = vmatpush.msra.mxu1 %v339_v4  ;;  %271 = vst.msk [vmem:[%s949_s6 + $0x38] sm:$0xff] %vm263_vm2, %v862_v17  ;;  %v332_v30 = vld [vmem:[%s924_s30 + $0x90] sm:$0xff]  ;;  %v289_v31 = vld [vmem:[%s949_s6] sm:$0xff] }
  0x18   : > { %770 = vmatmul.msk.f32.vlgmr.msra.gmra.mxu0 %vm344_vm1, %v314_v7  ;;  %776 = vmatmul.msk.f32.vlgmr.msra.gmra.mxu1 %vm344_vm1, %v320_v8  ;;  %272 = vst.msk [vmem:[%s949_s6 + $0x40] sm:$0xff] %vm263_vm2, %v862_v17  ;;  %v301_v37 = vld [vmem:[%s949_s6 + $0x60] sm:$0xff]  ;;  %v290_v43 = vld [vmem:[%s949_s6 + $0x8] sm:$0xff] }
  0x19   : > { %273 = vst.msk [vmem:[%s949_s6 + $0x48] sm:$0xff] %vm263_vm2, %v862_v17  ;;  %v291_v61 = vld [vmem:[%s949_s6 + $0x10] sm:$0xff] }
  0x1a   : > { %274 = vst.msk [vmem:[%s949_s6 + $0x50] sm:$0xff] %vm263_vm2, %v862_v17 }
  0x1b   : > { %275 = vst.msk [vmem:[%s949_s6 + $0x58] sm:$0xff] %vm263_vm2, %v862_v17 }
  0x1c   : > { %277 = vst.msk [vmem:[%s949_s6 + $0x68] sm:$0xff] %vm263_vm2, %v862_v17 }
  0x1d   : > { %278 = vst.msk [vmem:[%s949_s6 + $0x70] sm:$0xff] %vm263_vm2, %v862_v17  ;;  %v295_v32 = vld [vmem:[%s949_s6 + $0x30] sm:$0xff] }
  0x1e   : > { %783 = vmatmul.msk.f32.gmra.mxu2 %vm344_vm1, %v327_v9  ;;  %790 = vmatmul.msk.f32.gmra.mxu3 %vm344_vm1, %v334_v10  ;;  %279 = vst.msk [vmem:[%s949_s6 + $0x78] sm:$0xff] %vm263_vm2, %v862_v17  ;;  %v296_v44 = vld [vmem:[%s949_s6 + $0x38] sm:$0xff] }
  0x1f   : > { %280 = vst.msk [vmem:[%s949_s6 + $0x80] sm:$0xff] %vm263_vm2, %v862_v17  ;;  %v297_v62 = vld [vmem:[%s949_s6 + $0x40] sm:$0xff] }
  0x20   : > { %771 = vmatmul.msk.f32.gmra.mxu0 %vm344_vm1, %v315_v11  ;;  %777 = vmatmul.msk.f32.gmra.mxu1 %vm344_vm1, %v321_v12  ;;  %281 = vst.msk [vmem:[%s949_s6 + $0x88] sm:$0xff] %vm263_vm2, %v862_v17 }
  0x21   : > { %282 = vst.msk [vmem:[%s949_s6 + $0x90] sm:$0xff] %vm263_vm2, %v862_v17 }
  0x22   : > { %283 = vst.msk [vmem:[%s949_s6 + $0x98] sm:$0xff] %vm263_vm2, %v862_v17 }
  0x23   : > { %284 = vst.msk [vmem:[%s949_s6 + $0xa0] sm:$0xff] %vm263_vm2, %v862_v17  ;;  %v302_v51 = vld [vmem:[%s949_s6 + $0x68] sm:$0xff] }
  0x24   : > { %285 = vst.msk [vmem:[%s949_s6 + $0xa8] sm:$0xff] %vm263_vm2, %v862_v17  ;;  %v303_v7 = vld [vmem:[%s949_s6 + $0x70] sm:$0xff] }
  0x25   : > { %286 = vst.msk [vmem:[%s949_s6 + $0xb0] sm:$0xff] %vm263_vm2, %v862_v17 }
  0x26   : > { %784 = vmatmul.msk.f32.gmra.mxu2 %vm344_vm1, %v328_v13  ;;  %791 = vmatmul.msk.f32.gmra.mxu3 %vm344_vm1, %v335_v14  ;;  %287 = vst.msk [vmem:[%s949_s6 + $0xb8] sm:$0xff] %vm263_vm2, %v862_v17 }
  0x27   : > { %288 = vst.msk [vmem:[%s949_s6 + $0xc0] sm:$0xff] %vm263_vm2, %v862_v17  ;;  %v292_v17 = vld [vmem:[%s949_s6 + $0x18] sm:$0xff] }
  0x28   : > { %772 = vmatmul.msk.f32.gmra.mxu0 %vm344_vm1, %v316_v15  ;;  %778 = vmatmul.msk.f32.gmra.mxu1 %vm344_vm1, %v322_v16 }
  0x29   : > { %v308_v38 = vld [vmem:[%s949_s6 + $0x98] sm:$0xff] }
  0x2a   : > { %v309_v52 = vld [vmem:[%s949_s6 + $0xa0] sm:$0xff] }
  0x2b   : > { %v310_v8 = vld [vmem:[%s949_s6 + $0xa8] sm:$0xff] }
  0x2e   : > { %785 = vmatmul.msk.f32.gmra.mxu2 %vm344_vm1, %v329_v18  ;;  %792 = vmatmul.msk.f32.gmra.mxu3 %vm344_vm1, %v336_v19  ;;  %v298_v18 = vld [vmem:[%s949_s6 + $0x48] sm:$0xff] }
  0x30   : > { %773 = vmatmul.msk.f32.gmra.mxu0 %vm344_vm1, %v317_v20  ;;  %779 = vmatmul.msk.f32.gmra.mxu1 %vm344_vm1, %v323_v21 }
  0x36   : > { %786 = vmatmul.msk.f32.gmra.mxu2 %vm344_vm1, %v330_v22  ;;  %793 = vmatmul.msk.f32.gmra.mxu3 %vm344_vm1, %v337_v23 }
  0x38   : > { %774 = vmatmul.msk.f32.gmra.mxu0 %vm344_vm1, %v318_v24  ;;  %780 = vmatmul.msk.f32.gmra.mxu1 %vm344_vm1, %v324_v25 }
  0x3e   : > { %787 = vmatmul.msk.f32.gmra.mxu2 %vm344_vm1, %v331_v26  ;;  %794 = vmatmul.msk.f32.gmra.mxu3 %vm344_vm1, %v338_v27  ;;  %v304_v27 = vld [vmem:[%s949_s6 + $0x78] sm:$0xff] }
  0x40   : > { %775 = vmatmul.msk.f32.gmra.mxu0 %vm344_vm1, %v319_v28  ;;  %781 = vmatmul.msk.f32.gmra.mxu1 %vm344_vm1, %v325_v29  ;;  %v311_v28 = vld [vmem:[%s949_s6 + $0xb0] sm:$0xff] }
  0x46   : > { %788 = vmatmul.msk.f32.gmra.mxu2 %vm344_vm1, %v332_v30 }
  0x95   : > { %v441_v33 = vpop.f32.mrf.mxu0  ;;  %v459_v34 = vpop.f32.mrf.mxu1 }
  0x96   : > { %v516_v35 = vadd.f32 %v441_v33, %v289_v31  ;;  %v522_v36 = vadd.f32 %v459_v34, %v295_v32 }
  0x98   : > { %542 = vst.msk [vmem:[%s949_s6] sm:$0xff] %vm263_vm2, %v516_v35 }
  0x99   : > { %v477_v39 = vpop.f32.mrf.mxu2  ;;  %548 = vst.msk [vmem:[%s949_s6 + $0x30] sm:$0xff] %vm263_vm2, %v522_v36  ;;  %v498_v40 = vpop.f32.mrf.mxu3 }
  0x9a   : > { %v528_v41 = vadd.f32 %v477_v39, %v301_v37  ;;  %v535_v42 = vadd.f32 %v498_v40, %v308_v38  ;;  %v293_v37 = vld [vmem:[%s949_s6 + $0x20] sm:$0xff]  ;;  %v299_v38 = vld [vmem:[%s949_s6 + $0x50] sm:$0xff] }
  0x9c   : > { %554 = vst.msk [vmem:[%s949_s6 + $0x60] sm:$0xff] %vm263_vm2, %v528_v41 }
  0x9d   : > { %561 = vst.msk [vmem:[%s949_s6 + $0x98] sm:$0xff] %vm263_vm2, %v535_v42  ;;  %v444_v45 = vpop.f32.mrf.mxu0  ;;  %v462_v46 = vpop.f32.mrf.mxu1 }
  0x9e   : > { %v517_v48 = vadd.f32 %v444_v45, %v290_v43  ;;  %v523_v49 = vadd.f32 %v462_v46, %v296_v44 }
  0x9f   : > { %v570_v50 = vld [vmem:[%s949_s6] sm:$0xff] }
  0xa0   : > { %v599_v53 = vadd.f32 %v1050_v47, %v570_v50  ;;  %v576_v54 = vld [vmem:[%s949_s6 + $0x30] sm:$0xff]  ;;  %543 = vst.msk [vmem:[%s949_s6 + $0x8] sm:$0xff] %vm263_vm2, %v517_v48  ;;  %v305_v48 = vld [vmem:[%s949_s6 + $0x80] sm:$0xff] }
  0xa1   : > { %v605_v55 = vadd.f32 %v1050_v47, %v576_v54  ;;  %v480_v56 = vpop.f32.mrf.mxu2  ;;  %549 = vst.msk [vmem:[%s949_s6 + $0x38] sm:$0xff] %vm263_vm2, %v523_v49  ;;  %v501_v57 = vpop.f32.mrf.mxu3  ;;  %v312_v49 = vld [vmem:[%s949_s6 + $0xb8] sm:$0xff] }
  0xa2   : > { %624 = vst.msk [vmem:[%s949_s6] sm:$0xff] %vm263_vm2, %v599_v53  ;;  %v529_v58 = vadd.f32 %v480_v56, %v302_v51  ;;  %v536_v59 = vadd.f32 %v501_v57, %v309_v52 }
  0xa3   : > { %v582_v60 = vld [vmem:[%s949_s6 + $0x60] sm:$0xff]  ;;  %630 = vst.msk [vmem:[%s949_s6 + $0x30] sm:$0xff] %vm263_vm2, %v605_v55 }
  0xa4   : > { %v611_v63 = vadd.f32 %v1050_v47, %v582_v60  ;;  %555 = vst.msk [vmem:[%s949_s6 + $0x68] sm:$0xff] %vm263_vm2, %v529_v58  ;;  %v589_v0 = vld [vmem:[%s949_s6 + $0x98] sm:$0xff]  ;;  %v294_v58 = vld [vmem:[%s949_s6 + $0x28] sm:$0xff] }
  0xa5   : > { %v618_v1 = vadd.f32 %v1050_v47, %v589_v0  ;;  %562 = vst.msk [vmem:[%s949_s6 + $0xa0] sm:$0xff] %vm263_vm2, %v536_v59  ;;  %v447_v2 = vpop.f32.mrf.mxu0  ;;  %v465_v3 = vpop.f32.mrf.mxu1  ;;  %v300_v59 = vld [vmem:[%s949_s6 + $0x58] sm:$0xff] }
  0xa6   : > { %636 = vst.msk [vmem:[%s949_s6 + $0x60] sm:$0xff] %vm263_vm2, %v611_v63  ;;  %v518_v4 = vadd.f32 %v447_v2, %v291_v61  ;;  %v524_v5 = vadd.f32 %v465_v3, %v297_v62 }
  0xa7   : > { %643 = vst.msk [vmem:[%s949_s6 + $0x98] sm:$0xff] %vm263_vm2, %v618_v1  ;;  %v571_v6 = vld [vmem:[%s949_s6 + $0x8] sm:$0xff] }
  0xa8   : > { %v600_v9 = vadd.f32 %v1050_v47, %v571_v6  ;;  %v577_v10 = vld [vmem:[%s949_s6 + $0x38] sm:$0xff]  ;;  %544 = vst.msk [vmem:[%s949_s6 + $0x10] sm:$0xff] %vm263_vm2, %v518_v4  ;;  %v306_v4 = vld [vmem:[%s949_s6 + $0x88] sm:$0xff] }
  0xa9   : > { %v606_v11 = vadd.f32 %v1050_v47, %v577_v10  ;;  %v483_v12 = vpop.f32.mrf.mxu2  ;;  %550 = vst.msk [vmem:[%s949_s6 + $0x40] sm:$0xff] %vm263_vm2, %v524_v5  ;;  %v504_v13 = vpop.f32.mrf.mxu3  ;;  %v313_v5 = vld [vmem:[%s949_s6 + $0xc0] sm:$0xff] }
  0xaa   : > { %625 = vst.msk [vmem:[%s949_s6 + $0x8] sm:$0xff] %vm263_vm2, %v600_v9  ;;  %v530_v14 = vadd.f32 %v483_v12, %v303_v7  ;;  %v537_v15 = vadd.f32 %v504_v13, %v310_v8 }
  0xab   : > { %v583_v16 = vld [vmem:[%s949_s6 + $0x68] sm:$0xff]  ;;  %631 = vst.msk [vmem:[%s949_s6 + $0x38] sm:$0xff] %vm263_vm2, %v606_v11 }
  0xac   : > { %v612_v19 = vadd.f32 %v1050_v47, %v583_v16  ;;  %556 = vst.msk [vmem:[%s949_s6 + $0x70] sm:$0xff] %vm263_vm2, %v530_v14  ;;  %v590_v20 = vld [vmem:[%s949_s6 + $0xa0] sm:$0xff] }
  0xad   : > { %v619_v21 = vadd.f32 %v1050_v47, %v590_v20  ;;  %563 = vst.msk [vmem:[%s949_s6 + $0xa8] sm:$0xff] %vm263_vm2, %v537_v15  ;;  %v450_v22 = vpop.f32.mrf.mxu0  ;;  %v468_v23 = vpop.f32.mrf.mxu1 }
  0xae   : > { %637 = vst.msk [vmem:[%s949_s6 + $0x68] sm:$0xff] %vm263_vm2, %v612_v19  ;;  %v519_v24 = vadd.f32 %v450_v22, %v292_v17  ;;  %v525_v25 = vadd.f32 %v468_v23, %v298_v18  ;;  %v307_v18 = vld [vmem:[%s949_s6 + $0x90] sm:$0xff] }
  0xaf   : > { %644 = vst.msk [vmem:[%s949_s6 + $0xa0] sm:$0xff] %vm263_vm2, %v619_v21  ;;  %v572_v26 = vld [vmem:[%s949_s6 + $0x10] sm:$0xff] }
  0xb0   : > { %v601_v29 = vadd.f32 %v1050_v47, %v572_v26  ;;  %v578_v30 = vld [vmem:[%s949_s6 + $0x40] sm:$0xff]  ;;  %545 = vst.msk [vmem:[%s949_s6 + $0x18] sm:$0xff] %vm263_vm2, %v519_v24 }
  0xb1   : > { %v607_v31 = vadd.f32 %v1050_v47, %v578_v30  ;;  %v486_v32 = vpop.f32.mrf.mxu2  ;;  %551 = vst.msk [vmem:[%s949_s6 + $0x48] sm:$0xff] %vm263_vm2, %v525_v25  ;;  %v507_v33 = vpop.f32.mrf.mxu3 }
  0xb2   : > { %626 = vst.msk [vmem:[%s949_s6 + $0x10] sm:$0xff] %vm263_vm2, %v601_v29  ;;  %v531_v34 = vadd.f32 %v486_v32, %v304_v27  ;;  %v538_v35 = vadd.f32 %v507_v33, %v311_v28 }
  0xb3   : > { %v584_v36 = vld [vmem:[%s949_s6 + $0x70] sm:$0xff]  ;;  %632 = vst.msk [vmem:[%s949_s6 + $0x40] sm:$0xff] %vm263_vm2, %v607_v31 }
  0xb4   : > { %v613_v39 = vadd.f32 %v1050_v47, %v584_v36  ;;  %557 = vst.msk [vmem:[%s949_s6 + $0x78] sm:$0xff] %vm263_vm2, %v531_v34  ;;  %v591_v40 = vld [vmem:[%s949_s6 + $0xa8] sm:$0xff] }
  0xb5   : > { %v620_v41 = vadd.f32 %v1050_v47, %v591_v40  ;;  %564 = vst.msk [vmem:[%s949_s6 + $0xb0] sm:$0xff] %vm263_vm2, %v538_v35  ;;  %v453_v42 = vpop.f32.mrf.mxu0  ;;  %v471_v43 = vpop.f32.mrf.mxu1 }
  0xb6   : > { %638 = vst.msk [vmem:[%s949_s6 + $0x70] sm:$0xff] %vm263_vm2, %v613_v39  ;;  %v520_v44 = vadd.f32 %v453_v42, %v293_v37  ;;  %v526_v45 = vadd.f32 %v471_v43, %v299_v38 }
  0xb7   : > { %645 = vst.msk [vmem:[%s949_s6 + $0xa8] sm:$0xff] %vm263_vm2, %v620_v41  ;;  %v573_v46 = vld [vmem:[%s949_s6 + $0x18] sm:$0xff] }
  0xb8   : > { %v602_v50 = vadd.f32 %v1050_v47, %v573_v46  ;;  %v579_v51 = vld [vmem:[%s949_s6 + $0x48] sm:$0xff]  ;;  %546 = vst.msk [vmem:[%s949_s6 + $0x20] sm:$0xff] %vm263_vm2, %v520_v44 }
  0xb9   : > { %v608_v52 = vadd.f32 %v1050_v47, %v579_v51  ;;  %v489_v53 = vpop.f32.mrf.mxu2  ;;  %552 = vst.msk [vmem:[%s949_s6 + $0x50] sm:$0xff] %vm263_vm2, %v526_v45  ;;  %v510_v54 = vpop.f32.mrf.mxu3 }
  0xba   : > { %627 = vst.msk [vmem:[%s949_s6 + $0x18] sm:$0xff] %vm263_vm2, %v602_v50  ;;  %v532_v55 = vadd.f32 %v489_v53, %v305_v48  ;;  %v539_v56 = vadd.f32 %v510_v54, %v312_v49 }
  0xbb   : > { %v585_v57 = vld [vmem:[%s949_s6 + $0x78] sm:$0xff]  ;;  %633 = vst.msk [vmem:[%s949_s6 + $0x48] sm:$0xff] %vm263_vm2, %v608_v52 }
  0xbc   : > { %v614_v60 = vadd.f32 %v1050_v47, %v585_v57  ;;  %558 = vst.msk [vmem:[%s949_s6 + $0x80] sm:$0xff] %vm263_vm2, %v532_v55  ;;  %v592_v61 = vld [vmem:[%s949_s6 + $0xb0] sm:$0xff] }
  0xbd   : > { %v621_v62 = vadd.f32 %v1050_v47, %v592_v61  ;;  %565 = vst.msk [vmem:[%s949_s6 + $0xb8] sm:$0xff] %vm263_vm2, %v539_v56  ;;  %v456_v63 = vpop.f32.mrf.mxu0  ;;  %v474_v0 = vpop.f32.mrf.mxu1 }
  0xbe   : > { %639 = vst.msk [vmem:[%s949_s6 + $0x78] sm:$0xff] %vm263_vm2, %v614_v60  ;;  %v521_v1 = vadd.f32 %v456_v63, %v294_v58  ;;  %v527_v2 = vadd.f32 %v474_v0, %v300_v59 }
  0xbf   : > { %646 = vst.msk [vmem:[%s949_s6 + $0xb0] sm:$0xff] %vm263_vm2, %v621_v62  ;;  %v574_v3 = vld [vmem:[%s949_s6 + $0x20] sm:$0xff] }
  0xc0   : > { %v603_v6 = vadd.f32 %v1050_v47, %v574_v3  ;;  %v580_v7 = vld [vmem:[%s949_s6 + $0x50] sm:$0xff]  ;;  %547 = vst.msk [vmem:[%s949_s6 + $0x28] sm:$0xff] %vm263_vm2, %v521_v1 }
  0xc1   : > { %v609_v8 = vadd.f32 %v1050_v47, %v580_v7  ;;  %v492_v9 = vpop.f32.mrf.mxu2  ;;  %553 = vst.msk [vmem:[%s949_s6 + $0x58] sm:$0xff] %vm263_vm2, %v527_v2  ;;  %v513_v10 = vpop.f32.mrf.mxu3 }
  0xc2   : > { %628 = vst.msk [vmem:[%s949_s6 + $0x20] sm:$0xff] %vm263_vm2, %v603_v6  ;;  %v533_v11 = vadd.f32 %v492_v9, %v306_v4  ;;  %v540_v12 = vadd.f32 %v513_v10, %v313_v5 }
  0xc3   : > { %v586_v13 = vld [vmem:[%s949_s6 + $0x80] sm:$0xff]  ;;  %634 = vst.msk [vmem:[%s949_s6 + $0x50] sm:$0xff] %vm263_vm2, %v609_v8 }
  0xc4   : > { %v615_v14 = vadd.f32 %v1050_v47, %v586_v13  ;;  %559 = vst.msk [vmem:[%s949_s6 + $0x88] sm:$0xff] %vm263_vm2, %v533_v11  ;;  %v593_v15 = vld [vmem:[%s949_s6 + $0xb8] sm:$0xff] }
  0xc5   : > { %v622_v16 = vadd.f32 %v1050_v47, %v593_v15  ;;  %566 = vst.msk [vmem:[%s949_s6 + $0xc0] sm:$0xff] %vm263_vm2, %v540_v12 }
  0xc6   : > { %640 = vst.msk [vmem:[%s949_s6 + $0x80] sm:$0xff] %vm263_vm2, %v615_v14 }
  0xc7   : > { %647 = vst.msk [vmem:[%s949_s6 + $0xb8] sm:$0xff] %vm263_vm2, %v622_v16  ;;  %v575_v17 = vld [vmem:[%s949_s6 + $0x28] sm:$0xff] }
  0xc8   : > { %v604_v19 = vadd.f32 %v1050_v47, %v575_v17  ;;  %v581_v20 = vld [vmem:[%s949_s6 + $0x58] sm:$0xff] }
  0xc9   : > { %v610_v21 = vadd.f32 %v1050_v47, %v581_v20  ;;  %v495_v22 = vpop.f32.mrf.mxu2 }
  0xca   : > { %629 = vst.msk [vmem:[%s949_s6 + $0x28] sm:$0xff] %vm263_vm2, %v604_v19  ;;  %v534_v23 = vadd.f32 %v495_v22, %v307_v18 }
  0xcb   : > { %v587_v24 = vld [vmem:[%s949_s6 + $0x88] sm:$0xff]  ;;  %635 = vst.msk [vmem:[%s949_s6 + $0x58] sm:$0xff] %vm263_vm2, %v610_v21 }
  0xcc   : > { %v616_v25 = vadd.f32 %v1050_v47, %v587_v24  ;;  %560 = vst.msk [vmem:[%s949_s6 + $0x90] sm:$0xff] %vm263_vm2, %v534_v23  ;;  %v594_v26 = vld [vmem:[%s949_s6 + $0xc0] sm:$0xff] }
  0xcd   : > { %v623_v27 = vadd.f32 %v1050_v47, %v594_v26 }
  0xce   : > { %641 = vst.msk [vmem:[%s949_s6 + $0x88] sm:$0xff] %vm263_vm2, %v616_v25 }
  0xcf   : > { %648 = vst.msk [vmem:[%s949_s6 + $0xc0] sm:$0xff] %vm263_vm2, %v623_v27 }
  0xd3   : > { %v588_v28 = vld [vmem:[%s949_s6 + $0x90] sm:$0xff] }
  0xd4   : > { %v617_v29 = vadd.f32 %v1050_v47, %v588_v28 }
  0xd6   : > { %642 = vst.msk [vmem:[%s949_s6 + $0x90] sm:$0xff] %vm263_vm2, %v617_v29 }
  0xd7 PF: > { %s13_s14 = sadd.s32 1, %s860_s14   ;;  %s1226_s12 = smov %s856_s13 }
  0xd8   : > { %p10_p5 = scmp.ge.s32.totalorder %s13_s14, 4   ;;  %s1227_s13 = smov %s1229_s15 }
  0xda   :  { %12 = sbr.rel (!%p10_p5) target bundleno = 2 (0x2), region = 76 }

</bundles_post_ra>
